<compile_context>
chip_gen: v5e
topology: v5e:2x2
jax: 0.10.0
libtpu: 0.0.40
codegen_flags: <defaults>
</compile_context>

<pallas_src>
import functools

import jax
import jax.numpy as jnp
from jax.experimental import pallas as pl
from jax.experimental.pallas import tpu as pltpu


def _round_up(x, m):
    return ((x + m - 1) // m) * m


def _tpu_generation():
    try:
        kind = jax.devices()[0].device_kind.lower()
    except Exception:
        kind = ""
    if "v7" in kind:
        return "v7x"
    if "v6" in kind:
        return "v6e"
    if "v5" in kind:
        return "v5e"
    return "unknown"


# Per-generation tiling configuration.
_GEN_CFG = {
    # vmem_budget: what our own sizing math may plan against (conservative, double-buffered).
    # vmem_limit : value passed to CompilerParams(vmem_limit_bytes=...). None -> leave default.
    "v5e": dict(vmem_budget=88 * 2**20, vmem_limit=100 * 2**20, target_tm=512, two_cores=False),
    "v6e": dict(vmem_budget=88 * 2**20, vmem_limit=100 * 2**20, target_tm=1024, two_cores=False),
    "v7x": dict(vmem_budget=48 * 2**20, vmem_limit=56 * 2**20, target_tm=384, two_cores=True),
    "unknown": dict(vmem_budget=12 * 2**20, vmem_limit=None, target_tm=256, two_cores=False),
}


def _pick_chunk(H_p):
    """Hidden-dim chunk width (multiple of 128 dividing H_p, capped at 512)."""
    for c in (512, 384, 256, 128):
        if H_p % c == 0:
            return c
    return 128


# ---------------------------------------------------------------------------
# In-kernel building blocks (shared by both modes).
# ---------------------------------------------------------------------------
def _ff_layer(x_f32, w1_ref, b1_ref, w2_ref, b2_ref, li, *, chunk, n_chunks):
    """x + Linear2(relu(Linear1(x))) for layer `li`, hidden dim processed in chunks."""
    xb = x_f32.astype(jnp.bfloat16)
    y = None
    for c in range(n_chunks):                      # static unroll; offsets are compile-time
        lo, hi = c * chunk, (c + 1) * chunk
        h = (jnp.dot(xb, w1_ref[li, :, lo:hi], preferred_element_type=jnp.float32)
             + b1_ref[li, :, lo:hi])
        h = jnp.maximum(h, 0.0).astype(jnp.bfloat16)
        yc = jnp.dot(h, w2_ref[li, lo:hi, :], preferred_element_type=jnp.float32)
        y = yc if y is None else y + yc
    return x_f32 + y + b2_ref[li]


def _ln_out(x_f32, g_ref, beta_ref, w_out_ref, b_out_ref, *, d_real, d_pad):
    """LayerNorm (stats over the real n_embd columns) + output projection."""
    inv_d = 1.0 / d_real
    # Padded feature columns of x are exactly zero, so the plain sum is the real-column sum.
    mean = jnp.sum(x_f32, axis=-1, keepdims=True) * inv_d
    if d_real == d_pad:
        xc = x_f32 - mean
    else:
        col = jax.lax.broadcasted_iota(jnp.int32, x_f32.shape, 1)
        xc = jnp.where(col < d_real, x_f32 - mean, 0.0)
    var = jnp.sum(xc * xc, axis=-1, keepdims=True) * inv_d
    normed = xc * jax.lax.rsqrt(var + 1e-5) * g_ref[...] + beta_ref[...]
    return (jnp.dot(normed.astype(jnp.bfloat16), w_out_ref[...],
                    preferred_element_type=jnp.float32) + b_out_ref[...])


# ---------------------------------------------------------------------------
# Kernel, streaming mode.  Grid = (batch_tile i, layer l); acc resident in VMEM scratch.
# ---------------------------------------------------------------------------
def _mlp_stream_kernel(x_ref, w_in_ref, b_in_ref, w1_ref, b1_ref, w2_ref, b2_ref,
                       g_ref, beta_ref, w_out_ref, b_out_ref, o_ref, acc_ref,
                       *, d_real, d_pad, chunk, n_chunks):
    l = pl.program_id(1)

    @pl.when(l == 0)
    def _():
        acc_ref[...] = (jnp.dot(x_ref[...], w_in_ref[...],
                                preferred_element_type=jnp.float32) + b_in_ref[...])

    acc_ref[...] = _ff_layer(acc_ref[...], w1_ref, b1_ref, w2_ref, b2_ref, 0,
                             chunk=chunk, n_chunks=n_chunks)

    @pl.when(l == pl.num_programs(1) - 1)
    def _():
        o_ref[...] = _ln_out(acc_ref[...], g_ref, beta_ref, w_out_ref, b_out_ref,
                             d_real=d_real, d_pad=d_pad)


# ---------------------------------------------------------------------------
# Kernel, resident mode.  Grid = (batch_tile i,); full weight stacks live in VMEM,
# layer loop unrolled inside the kernel.
# ---------------------------------------------------------------------------
def _mlp_resident_kernel(x_ref, w_in_ref, b_in_ref, w1_ref, b1_ref, w2_ref, b2_ref,
                         g_ref, beta_ref, w_out_ref, b_out_ref, o_ref,
                         *, d_real, d_pad, chunk, n_chunks, num_layers):
    acc = (jnp.dot(x_ref[...], w_in_ref[...],
                   preferred_element_type=jnp.float32) + b_in_ref[...])
    for li in range(num_layers):
        acc = _ff_layer(acc, w1_ref, b1_ref, w2_ref, b2_ref, li,
                        chunk=chunk, n_chunks=n_chunks)
    o_ref[...] = _ln_out(acc, g_ref, beta_ref, w_out_ref, b_out_ref,
                         d_real=d_real, d_pad=d_pad)


# ---------------------------------------------------------------------------
# Parameter construction (PyTorch Linear default init) and TPU packing.
# ---------------------------------------------------------------------------
def _init_linear(key, fan_in, fan_out):
    kw, kb = jax.random.split(key)
    bound = 1.0 / jnp.sqrt(jnp.float32(fan_in))
    w = jax.random.uniform(kw, (fan_in, fan_out), jnp.float32, -bound, bound)
    b = jax.random.uniform(kb, (1, fan_out), jnp.float32, -bound, bound)
    return w, b


def init_mlp_params(key, input_dim, output_dim, num_layers, n_embd):
    keys = jax.random.split(key, 2 + max(num_layers, 1))
    params = {}
    params["in_w"], params["in_b"] = _init_linear(keys[0], input_dim, n_embd)
    params["layers"] = []
    for i in range(num_layers):
        k1, k2 = jax.random.split(keys[1 + i])
        w1, b1 = _init_linear(k1, n_embd, 4 * n_embd)
        w2, b2 = _init_linear(k2, 4 * n_embd, n_embd)
        params["layers"].append((w1, b1, w2, b2))
    params["ln_g"] = jnp.ones((1, n_embd), jnp.float32)
    params["ln_b"] = jnp.zeros((1, n_embd), jnp.float32)
    params["out_w"], params["out_b"] = _init_linear(keys[-1], n_embd, output_dim)
    return params


def pack_params(params):
    """Pad feature dims to 128 multiples, stack per-layer weights, cast matmul operands to
    bf16.  Zero padding keeps every stage numerically exact."""
    in_w, in_b = params["in_w"], params["in_b"]
    out_w, out_b = params["out_w"], params["out_b"]
    input_dim, n_embd = in_w.shape
    output_dim = out_w.shape[1]
    hidden = 4 * n_embd
    L = len(params["layers"])

    In_p = _round_up(input_dim, 128)
    D_p = _round_up(n_embd, 128)
    H_p = _round_up(hidden, 128)
    O_p = _round_up(output_dim, 128)
    L_g = max(L, 1)  # L == 0 -> one all-zero layer == identity residual block

    def pad2(a, r, c, dtype):
        z = jnp.zeros((r, c), dtype)
        return z.at[: a.shape[0], : a.shape[1]].set(a.astype(dtype))

    w1s = jnp.zeros((L_g, D_p, H_p), jnp.bfloat16)
    b1s = jnp.zeros((L_g, 1, H_p), jnp.float32)
    w2s = jnp.zeros((L_g, H_p, D_p), jnp.bfloat16)
    b2s = jnp.zeros((L_g, 1, D_p), jnp.float32)
    for i, (w1, b1, w2, b2) in enumerate(params["layers"]):
        w1s = w1s.at[i, :n_embd, :hidden].set(w1.astype(jnp.bfloat16))
        b1s = b1s.at[i, :, :hidden].set(b1)
        w2s = w2s.at[i, :hidden, :n_embd].set(w2.astype(jnp.bfloat16))
        b2s = b2s.at[i, :, :n_embd].set(b2)

    return {
        "in_w": pad2(in_w, In_p, D_p, jnp.bfloat16),
        "in_b": pad2(in_b, 1, D_p, jnp.float32),
        "w1": w1s, "b1": b1s, "w2": w2s, "b2": b2s,
        "ln_g": pad2(params["ln_g"], 1, D_p, jnp.float32),
        "ln_b": pad2(params["ln_b"], 1, D_p, jnp.float32),
        "out_w": pad2(out_w, D_p, O_p, jnp.bfloat16),
        "out_b": pad2(out_b, 1, O_p, jnp.float32),
        "dims": dict(input_dim=input_dim, n_embd=n_embd,
                     output_dim=output_dim, num_layers=L),
    }


# ---------------------------------------------------------------------------
# Tile selection.
# ---------------------------------------------------------------------------
def _select_tm(B, In_p, D_p, H_p, O_p, L_g, chunk, cfg, resident, tm_override):
    Bp0 = _round_up(B, 8)
    if tm_override is not None:
        tm = max(8, min(_round_up(int(tm_override), 8), Bp0))
    else:
        # Fixed (batch-independent), conservatively double-buffered VMEM footprint.
        if resident:
            w_bytes = 2 * L_g * (D_p * H_p + H_p * D_p) * 2      # full stacks, bf16
        else:
            w_bytes = 2 * (D_p * H_p + H_p * D_p) * 2            # one streamed layer, bf16
        w_bytes += 2 * (In_p * D_p + D_p * O_p) * 2              # W_in + W_out, bf16
        w_bytes += 8 * (L_g * (H_p + D_p) + 3 * D_p + O_p) * 4   # biases / LN params (generous)
        avail = cfg["vmem_budget"] - w_bytes
        per_row = (2 * In_p * 2        # x tile, bf16, 2 buffers
                   + 2 * O_p * 4       # out tile, f32, 2 buffers
                   + 2 * D_p * 4       # acc + residual accumulator, f32
                   + chunk * 6)        # live hidden chunk (f32 + bf16)
        tm_cap = avail // per_row if avail > per_row * 8 else 8
        tm = min(cfg["target_tm"], int(tm_cap), Bp0)
        if cfg["two_cores"] and Bp0 >= 16:
            # Guarantee >=2 batch tiles so both TensorCores get work.
            tm = min(tm, _round_up(-(-Bp0 // 2), 8))
        tm = (tm // 128) * 128 if tm >= 128 else max(8, (tm // 8) * 8)
    Bp = _round_up(Bp0, tm)
    return tm, Bp


# ---------------------------------------------------------------------------
# Wrapper.
# ---------------------------------------------------------------------------
def mlp_forward(packed, x, *, tm=None, mode=None):
    dims = packed["dims"]
    B = x.shape[0]
    x2d = x.reshape(B, -1)                              # nn.Flatten()
    assert x2d.shape[1] == dims["input_dim"]

    In_p, D_p = packed["in_w"].shape
    H_p = packed["w1"].shape[2]
    O_p = packed["out_w"].shape[1]
    L_g = packed["w1"].shape[0]
    L = int(dims["num_layers"])
    d_real = int(dims["n_embd"])

    gen = _tpu_generation()
    cfg = _GEN_CFG.get(gen, _GEN_CFG["unknown"])
    chunk = _pick_chunk(H_p)
    n_chunks = H_p // chunk

    # Mode: keep full weight stacks resident when they comfortably fit, else stream per layer.
    resident_fixed = 2 * (L_g * (D_p * H_p + H_p * D_p) + In_p * D_p + D_p * O_p) * 2
    if mode == "resident":
        use_resident = True
    elif mode == "stream":
        use_resident = False
    else:
        use_resident = resident_fixed <= cfg["vmem_budget"] // 2

    tm, Bp = _select_tm(B, In_p, D_p, H_p, O_p, L_g, chunk, cfg, use_resident, tm)
    n_tiles = Bp // tm

    # Input pre-cast to bf16 (halves x DMA + VMEM; matmul operands are bf16 anyway).
    xp = jnp.zeros((Bp, In_p), jnp.bfloat16).at[:B, : x2d.shape[1]].set(
        x2d.astype(jnp.bfloat16))

    # Cost estimate (advisory): layer weights are re-streamed once per batch tile in stream mode.
    flops = 2 * Bp * (In_p * D_p + L_g * 2 * D_p * H_p + D_p * O_p)
    layer_w_bytes = L_g * ((D_p * H_p + H_p * D_p) * 2 + (H_p + D_p) * 4)
    other_w_bytes = (In_p * D_p + D_p * O_p) * 2 + (3 * D_p + O_p) * 4
    bytes_accessed = (xp.size * 2 + Bp * O_p * 4 + other_w_bytes
                      + layer_w_bytes * (1 if use_resident else n_tiles))
    cost = pl.CostEstimate(flops=int(flops), transcendentals=int(Bp),
                           bytes_accessed=int(bytes_accessed))

    if use_resident:
        kernel = functools.partial(_mlp_resident_kernel, d_real=d_real, d_pad=D_p,
                                   chunk=chunk, n_chunks=n_chunks, num_layers=L)
        grid_spec = pltpu.PrefetchScalarGridSpec(
            num_scalar_prefetch=0,
            grid=(n_tiles,),
            in_specs=[
                pl.BlockSpec((tm, In_p), lambda i: (i, 0)),          # x tile (bf16)
                pl.BlockSpec((In_p, D_p), lambda i: (0, 0)),         # W_in
                pl.BlockSpec((1, D_p), lambda i: (0, 0)),            # b_in
                pl.BlockSpec((L_g, D_p, H_p), lambda i: (0, 0, 0)),  # W1 stack (resident)
                pl.BlockSpec((L_g, 1, H_p), lambda i: (0, 0, 0)),    # b1 stack
                pl.BlockSpec((L_g, H_p, D_p), lambda i: (0, 0, 0)),  # W2 stack (resident)
                pl.BlockSpec((L_g, 1, D_p), lambda i: (0, 0, 0)),    # b2 stack
                pl.BlockSpec((1, D_p), lambda i: (0, 0)),            # ln gamma
                pl.BlockSpec((1, D_p), lambda i: (0, 0)),            # ln beta
                pl.BlockSpec((D_p, O_p), lambda i: (0, 0)),          # W_out
                pl.BlockSpec((1, O_p), lambda i: (0, 0)),            # b_out
            ],
            out_specs=pl.BlockSpec((tm, O_p), lambda i: (i, 0)),
        )
        dim_sem = ("parallel",)
    else:
        kernel = functools.partial(_mlp_stream_kernel, d_real=d_real, d_pad=D_p,
                                   chunk=chunk, n_chunks=n_chunks)
        grid_spec = pltpu.PrefetchScalarGridSpec(
            num_scalar_prefetch=0,
            grid=(n_tiles, L_g),
            in_specs=[
                pl.BlockSpec((tm, In_p), lambda i, l: (i, 0)),        # x tile (bf16)
                pl.BlockSpec((In_p, D_p), lambda i, l: (0, 0)),       # W_in
                pl.BlockSpec((1, D_p), lambda i, l: (0, 0)),          # b_in
                pl.BlockSpec((1, D_p, H_p), lambda i, l: (l, 0, 0)),  # W1[l] (streamed)
                pl.BlockSpec((1, 1, H_p), lambda i, l: (l, 0, 0)),    # b1[l]
                pl.BlockSpec((1, H_p, D_p), lambda i, l: (l, 0, 0)),  # W2[l] (streamed)
                pl.BlockSpec((1, 1, D_p), lambda i, l: (l, 0, 0)),    # b2[l]
                pl.BlockSpec((1, D_p), lambda i, l: (0, 0)),          # ln gamma
                pl.BlockSpec((1, D_p), lambda i, l: (0, 0)),          # ln beta
                pl.BlockSpec((D_p, O_p), lambda i, l: (0, 0)),        # W_out
                pl.BlockSpec((1, O_p), lambda i, l: (0, 0)),          # b_out
            ],
            out_specs=pl.BlockSpec((tm, O_p), lambda i, l: (i, 0)),
            scratch_shapes=[pltpu.VMEM((tm, D_p), jnp.float32)],      # resident activation
        )
        dim_sem = ("parallel", "arbitrary")

    out_p = pl.pallas_call(
        kernel,
        out_shape=jax.ShapeDtypeStruct((Bp, O_p), jnp.float32),
        grid_spec=grid_spec,
        compiler_params=pltpu.CompilerParams(
            dimension_semantics=dim_sem,
            vmem_limit_bytes=cfg["vmem_limit"],
        ),
        cost_estimate=cost,
    )(xp, packed["in_w"], packed["in_b"], packed["w1"], packed["b1"],
      packed["w2"], packed["b2"], packed["ln_g"], packed["ln_b"],
      packed["out_w"], packed["out_b"])

    return out_p[:B, : dims["output_dim"]]


# ---------------------------------------------------------------------------
# Pure-JAX references.
# ---------------------------------------------------------------------------
def mlp_forward_ref_f32(params, x):
    B = x.shape[0]
    out = x.reshape(B, -1).astype(jnp.float32) @ params["in_w"] + params["in_b"]
    for (w1, b1, w2, b2) in params["layers"]:
        h = jnp.maximum(out @ w1 + b1, 0.0)
        out = out + (h @ w2 + b2)
    mean = jnp.mean(out, axis=-1, keepdims=True)
    var = jnp.mean((out - mean) ** 2, axis=-1, keepdims=True)
    out = (out - mean) * jax.lax.rsqrt(var + 1e-5) * params["ln_g"] + params["ln_b"]
    return out @ params["out_w"] + params["out_b"]


def mlp_forward_ref_mixed(params, x):
    """Mirrors the kernel's bf16-operand / f32-accumulate matmuls."""
    def mm(a, w):
        return jnp.dot(a.astype(jnp.bfloat16), w.astype(jnp.bfloat16),
                       preferred_element_type=jnp.float32)
    B = x.shape[0]
    out = mm(x.reshape(B, -1).astype(jnp.float32), params["in_w"]) + params["in_b"]
    for (w1, b1, w2, b2) in params["layers"]:
        h = jnp.maximum(mm(out, w1) + b1, 0.0)
        out = out + mm(h, w2) + b2
    mean = jnp.mean(out, axis=-1, keepdims=True)
    var = jnp.mean((out - mean) ** 2, axis=-1, keepdims=True)
    out = (out - mean) * jax.lax.rsqrt(var + 1e-5) * params["ln_g"] + params["ln_b"]
    return mm(out, params["out_w"]) + params["out_b"]


def _rel_err(a, b):
    return float(jnp.max(jnp.abs(a - b)) / (jnp.max(jnp.abs(b)) + 1e-6))


if __name__ == "__main__":
    key = jax.random.PRNGKey(0)
    k_p1, k_p2, k_x1, k_x2 = jax.random.split(key, 4)

    # ---- Config A: tiny model, n_embd not 128-aligned -> resident mode, masked LayerNorm.
    B, C, F = 8, 4, 8
    input_dim, n_embd, output_dim, num_layers = C * F, 32, 16, 2
    params = init_mlp_params(k_p1, input_dim, output_dim, num_layers, n_embd)
    packed = pack_params(params)
    x = jax.random.normal(k_x1, (B, C, F), jnp.float32)

    out = jax.block_until_ready(mlp_forward(packed, x))
    assert out.shape == (B, output_dim), out.shape
    ref_m = mlp_forward_ref_mixed(params, x)
    ref_f = mlp_forward_ref_f32(params, x)
    assert jnp.allclose(out, ref_m, atol=1e-3, rtol=1e-3), "A: mismatch vs mixed-precision ref"
    assert _rel_err(out, ref_f) < 5e-2, "A: mismatch vs f32 ref"

    # ---- Config B: forced streaming path, multiple batch tiles, multiple hidden chunks,
    #      128-aligned n_embd -> unmasked LayerNorm epilogue.
    B2, C2, F2 = 24, 4, 16
    input_dim2, n_embd2, output_dim2, num_layers2 = C2 * F2, 256, 8, 3
    params2 = init_mlp_params(k_p2, input_dim2, output_dim2, num_layers2, n_embd2)
    packed2 = pack_params(params2)
    x2 = jax.random.normal(k_x2, (B2, C2, F2), jnp.float32)

    out2 = jax.block_until_ready(mlp_forward(packed2, x2, mode="stream", tm=8))
    assert out2.shape == (B2, output_dim2), out2.shape
    ref2_m = mlp_forward_ref_mixed(params2, x2)
    ref2_f = mlp_forward_ref_f32(params2, x2)
    assert jnp.allclose(out2, ref2_m, atol=2e-3, rtol=2e-3), "B: mismatch vs mixed-precision ref"
    assert _rel_err(out2, ref2_f) < 5e-2, "B: mismatch vs f32 ref"

    print("KERNEL_OK")
</pallas_src>

<mosaic_0001>
module attributes {stable_mosaic.version = 11 : i64} {
  func.func @_mlp_resident_kernel(%arg0: i32, %arg1: memref<8x128xbf16, #tpu.memory_space<vmem>>, %arg2: memref<128x128xbf16, #tpu.memory_space<vmem>>, %arg3: memref<1x128xf32, #tpu.memory_space<vmem>>, %arg4: memref<2x128x128xbf16, #tpu.memory_space<vmem>>, %arg5: memref<2x1x128xf32, #tpu.memory_space<vmem>>, %arg6: memref<2x128x128xbf16, #tpu.memory_space<vmem>>, %arg7: memref<2x1x128xf32, #tpu.memory_space<vmem>>, %arg8: memref<1x128xf32, #tpu.memory_space<vmem>>, %arg9: memref<1x128xf32, #tpu.memory_space<vmem>>, %arg10: memref<128x128xbf16, #tpu.memory_space<vmem>>, %arg11: memref<1x128xf32, #tpu.memory_space<vmem>>, %arg12: memref<8x128xf32, #tpu.memory_space<vmem>>) attributes {dimension_semantics = [#tpu.dimension_semantics<parallel>], iteration_bounds = array<i64: 1>, scalar_prefetch = 0 : i64, scratch_operands = 0 : i64, tpu.core_type = #tpu.core_type<tc>, window_params = [{transform_indices = @transform_0, window_bounds = array<i64: 8, 128>}, {pipeline_mode = #tpu.pipeline_mode<synchronous>, transform_indices = @transform_1, window_bounds = array<i64: 128, 128>}, {pipeline_mode = #tpu.pipeline_mode<synchronous>, transform_indices = @transform_2, window_bounds = array<i64: 1, 128>}, {pipeline_mode = #tpu.pipeline_mode<synchronous>, transform_indices = @transform_3, window_bounds = array<i64: 2, 128, 128>}, {pipeline_mode = #tpu.pipeline_mode<synchronous>, transform_indices = @transform_4, window_bounds = array<i64: 2, 1, 128>}, {pipeline_mode = #tpu.pipeline_mode<synchronous>, transform_indices = @transform_5, window_bounds = array<i64: 2, 128, 128>}, {pipeline_mode = #tpu.pipeline_mode<synchronous>, transform_indices = @transform_6, window_bounds = array<i64: 2, 1, 128>}, {pipeline_mode = #tpu.pipeline_mode<synchronous>, transform_indices = @transform_7, window_bounds = array<i64: 1, 128>}, {pipeline_mode = #tpu.pipeline_mode<synchronous>, transform_indices = @transform_8, window_bounds = array<i64: 1, 128>}, {pipeline_mode = #tpu.pipeline_mode<synchronous>, transform_indices = @transform_9, window_bounds = array<i64: 128, 128>}, {pipeline_mode = #tpu.pipeline_mode<synchronous>, transform_indices = @transform_10, window_bounds = array<i64: 1, 128>}, {transform_indices = @transform_11, window_bounds = array<i64: 8, 128>}]} {
    %c0 = arith.constant 0 : index
    %c0_0 = arith.constant 0 : index
    %0 = vector.load %arg1[%c0, %c0_0] : memref<8x128xbf16, #tpu.memory_space<vmem>>, vector<8x128xbf16>
    %c0_1 = arith.constant 0 : index
    %c0_2 = arith.constant 0 : index
    %1 = vector.load %arg2[%c0_1, %c0_2] : memref<128x128xbf16, #tpu.memory_space<vmem>>, vector<128x128xbf16>
    %cst = arith.constant dense<0.000000e+00> : vector<8x128xf32>
    %2 = tpu.matmul %0, %1, %cst {dimension_numbers = #tpu.dot_dimension_numbers<[1], [0], [0], [1], [0, 0, 1, 1], [], []>} : vector<8x128xbf16>, vector<128x128xbf16>, vector<8x128xf32> -> vector<8x128xf32>
    %c0_3 = arith.constant 0 : index
    %c0_4 = arith.constant 0 : index
    %3 = vector.load %arg3[%c0_3, %c0_4] : memref<1x128xf32, #tpu.memory_space<vmem>>, vector<1x128xf32>
    %4 = vector.broadcast %3 : vector<1x128xf32> to vector<8x128xf32>
    %5 = arith.addf %2, %4 : vector<8x128xf32>
    %6 = arith.truncf %5 : vector<8x128xf32> to vector<8x128xbf16>
    %c0_5 = arith.constant 0 : index
    %c0_6 = arith.constant 0 : index
    %c0_7 = arith.constant 0 : index
    %7 = vector.load %arg4[%c0_5, %c0_6, %c0_7] : memref<2x128x128xbf16, #tpu.memory_space<vmem>>, vector<1x128x128xbf16>
    %8 = vector.shape_cast %7 : vector<1x128x128xbf16> to vector<128x128xbf16>
    %cst_8 = arith.constant dense<0.000000e+00> : vector<8x128xf32>
    %9 = tpu.matmul %6, %8, %cst_8 {dimension_numbers = #tpu.dot_dimension_numbers<[1], [0], [0], [1], [0, 0, 1, 1], [], []>} : vector<8x128xbf16>, vector<128x128xbf16>, vector<8x128xf32> -> vector<8x128xf32>
    %c0_9 = arith.constant 0 : index
    %c0_10 = arith.constant 0 : index
    %c0_11 = arith.constant 0 : index
    %10 = vector.load %arg5[%c0_9, %c0_10, %c0_11] : memref<2x1x128xf32, #tpu.memory_space<vmem>>, vector<1x1x128xf32>
    %11 = vector.shape_cast %10 : vector<1x1x128xf32> to vector<1x128xf32>
    %12 = vector.broadcast %11 : vector<1x128xf32> to vector<8x128xf32>
    %13 = arith.addf %9, %12 : vector<8x128xf32>
    %cst_12 = arith.constant 0.000000e+00 : f32
    %14 = vector.broadcast %cst_12 : f32 to vector<8x128xf32>
    %15 = arith.maximumf %13, %14 : vector<8x128xf32>
    %16 = arith.truncf %15 : vector<8x128xf32> to vector<8x128xbf16>
    %c0_13 = arith.constant 0 : index
    %c0_14 = arith.constant 0 : index
    %c0_15 = arith.constant 0 : index
    %17 = vector.load %arg6[%c0_13, %c0_14, %c0_15] : memref<2x128x128xbf16, #tpu.memory_space<vmem>>, vector<1x128x128xbf16>
    %18 = vector.shape_cast %17 : vector<1x128x128xbf16> to vector<128x128xbf16>
    %cst_16 = arith.constant dense<0.000000e+00> : vector<8x128xf32>
    %19 = tpu.matmul %16, %18, %cst_16 {dimension_numbers = #tpu.dot_dimension_numbers<[1], [0], [0], [1], [0, 0, 1, 1], [], []>} : vector<8x128xbf16>, vector<128x128xbf16>, vector<8x128xf32> -> vector<8x128xf32>
    %20 = arith.addf %5, %19 : vector<8x128xf32>
    %c0_17 = arith.constant 0 : index
    %c0_18 = arith.constant 0 : index
    %c0_19 = arith.constant 0 : index
    %21 = vector.load %arg7[%c0_17, %c0_18, %c0_19] : memref<2x1x128xf32, #tpu.memory_space<vmem>>, vector<1x1x128xf32>
    %22 = vector.shape_cast %21 : vector<1x1x128xf32> to vector<1x128xf32>
    %23 = vector.broadcast %22 : vector<1x128xf32> to vector<8x128xf32>
    %24 = arith.addf %20, %23 : vector<8x128xf32>
    %25 = arith.truncf %24 : vector<8x128xf32> to vector<8x128xbf16>
    %c1 = arith.constant 1 : index
    %c0_20 = arith.constant 0 : index
    %c0_21 = arith.constant 0 : index
    %26 = vector.load %arg4[%c1, %c0_20, %c0_21] : memref<2x128x128xbf16, #tpu.memory_space<vmem>>, vector<1x128x128xbf16>
    %27 = vector.shape_cast %26 : vector<1x128x128xbf16> to vector<128x128xbf16>
    %cst_22 = arith.constant dense<0.000000e+00> : vector<8x128xf32>
    %28 = tpu.matmul %25, %27, %cst_22 {dimension_numbers = #tpu.dot_dimension_numbers<[1], [0], [0], [1], [0, 0, 1, 1], [], []>} : vector<8x128xbf16>, vector<128x128xbf16>, vector<8x128xf32> -> vector<8x128xf32>
    %c1_23 = arith.constant 1 : index
    %c0_24 = arith.constant 0 : index
    %c0_25 = arith.constant 0 : index
    %29 = vector.load %arg5[%c1_23, %c0_24, %c0_25] : memref<2x1x128xf32, #tpu.memory_space<vmem>>, vector<1x1x128xf32>
    %30 = vector.shape_cast %29 : vector<1x1x128xf32> to vector<1x128xf32>
    %31 = vector.broadcast %30 : vector<1x128xf32> to vector<8x128xf32>
    %32 = arith.addf %28, %31 : vector<8x128xf32>
    %cst_26 = arith.constant 0.000000e+00 : f32
    %33 = vector.broadcast %cst_26 : f32 to vector<8x128xf32>
    %34 = arith.maximumf %32, %33 : vector<8x128xf32>
    %35 = arith.truncf %34 : vector<8x128xf32> to vector<8x128xbf16>
    %c1_27 = arith.constant 1 : index
    %c0_28 = arith.constant 0 : index
    %c0_29 = arith.constant 0 : index
    %36 = vector.load %arg6[%c1_27, %c0_28, %c0_29] : memref<2x128x128xbf16, #tpu.memory_space<vmem>>, vector<1x128x128xbf16>
    %37 = vector.shape_cast %36 : vector<1x128x128xbf16> to vector<128x128xbf16>
    %cst_30 = arith.constant dense<0.000000e+00> : vector<8x128xf32>
    %38 = tpu.matmul %35, %37, %cst_30 {dimension_numbers = #tpu.dot_dimension_numbers<[1], [0], [0], [1], [0, 0, 1, 1], [], []>} : vector<8x128xbf16>, vector<128x128xbf16>, vector<8x128xf32> -> vector<8x128xf32>
    %39 = arith.addf %24, %38 : vector<8x128xf32>
    %c1_31 = arith.constant 1 : index
    %c0_32 = arith.constant 0 : index
    %c0_33 = arith.constant 0 : index
    %40 = vector.load %arg7[%c1_31, %c0_32, %c0_33] : memref<2x1x128xf32, #tpu.memory_space<vmem>>, vector<1x1x128xf32>
    %41 = vector.shape_cast %40 : vector<1x1x128xf32> to vector<1x128xf32>
    %42 = vector.broadcast %41 : vector<1x128xf32> to vector<8x128xf32>
    %43 = arith.addf %39, %42 : vector<8x128xf32>
    %cst_34 = arith.constant dense<0.000000e+00> : vector<8xf32>
    %44 = vector.multi_reduction <add>, %43, %cst_34 [1] : vector<8x128xf32> to vector<8xf32>
    %45 = vector.shape_cast %44 : vector<8xf32> to vector<8x1xf32>
    %cst_35 = arith.constant 3.125000e-02 : f32
    %46 = vector.broadcast %cst_35 : f32 to vector<8x1xf32>
    %47 = arith.mulf %45, %46 : vector<8x1xf32>
    %48 = tpu.iota {dimensions = array<i32: 1>} : vector<8x128xi32>
    %c32_i32 = arith.constant 32 : i32
    %49 = vector.broadcast %c32_i32 : i32 to vector<8x128xi32>
    %50 = arith.cmpi slt, %48, %49 : vector<8x128xi32>
    %51 = vector.broadcast %47 : vector<8x1xf32> to vector<8x128xf32>
    %52 = arith.subf %43, %51 : vector<8x128xf32>
    %cst_36 = arith.constant 0.000000e+00 : f32
    %53 = vector.broadcast %cst_36 : f32 to vector<8x128xf32>
    %54 = arith.select %50, %52, %53 : vector<8x128xi1>, vector<8x128xf32>
    %55 = arith.mulf %54, %54 : vector<8x128xf32>
    %cst_37 = arith.constant dense<0.000000e+00> : vector<8xf32>
    %56 = vector.multi_reduction <add>, %55, %cst_37 [1] : vector<8x128xf32> to vector<8xf32>
    %57 = vector.shape_cast %56 : vector<8xf32> to vector<8x1xf32>
    %cst_38 = arith.constant 3.125000e-02 : f32
    %58 = vector.broadcast %cst_38 : f32 to vector<8x1xf32>
    %59 = arith.mulf %57, %58 : vector<8x1xf32>
    %cst_39 = arith.constant 9.99999974E-6 : f32
    %60 = vector.broadcast %cst_39 : f32 to vector<8x1xf32>
    %61 = arith.addf %59, %60 : vector<8x1xf32>
    %62 = math.rsqrt %61 : vector<8x1xf32>
    %63 = vector.broadcast %62 : vector<8x1xf32> to vector<8x128xf32>
    %64 = arith.mulf %54, %63 : vector<8x128xf32>
    %c0_40 = arith.constant 0 : index
    %c0_41 = arith.constant 0 : index
    %65 = vector.load %arg8[%c0_40, %c0_41] : memref<1x128xf32, #tpu.memory_space<vmem>>, vector<1x128xf32>
    %66 = vector.broadcast %65 : vector<1x128xf32> to vector<8x128xf32>
    %67 = arith.mulf %64, %66 : vector<8x128xf32>
    %c0_42 = arith.constant 0 : index
    %c0_43 = arith.constant 0 : index
    %68 = vector.load %arg9[%c0_42, %c0_43] : memref<1x128xf32, #tpu.memory_space<vmem>>, vector<1x128xf32>
    %69 = vector.broadcast %68 : vector<1x128xf32> to vector<8x128xf32>
    %70 = arith.addf %67, %69 : vector<8x128xf32>
    %71 = arith.truncf %70 : vector<8x128xf32> to vector<8x128xbf16>
    %c0_44 = arith.constant 0 : index
    %c0_45 = arith.constant 0 : index
    %72 = vector.load %arg10[%c0_44, %c0_45] : memref<128x128xbf16, #tpu.memory_space<vmem>>, vector<128x128xbf16>
    %cst_46 = arith.constant dense<0.000000e+00> : vector<8x128xf32>
    %73 = tpu.matmul %71, %72, %cst_46 {dimension_numbers = #tpu.dot_dimension_numbers<[1], [0], [0], [1], [0, 0, 1, 1], [], []>} : vector<8x128xbf16>, vector<128x128xbf16>, vector<8x128xf32> -> vector<8x128xf32>
    %c0_47 = arith.constant 0 : index
    %c0_48 = arith.constant 0 : index
    %74 = vector.load %arg11[%c0_47, %c0_48] : memref<1x128xf32, #tpu.memory_space<vmem>>, vector<1x128xf32>
    %75 = vector.broadcast %74 : vector<1x128xf32> to vector<8x128xf32>
    %76 = arith.addf %73, %75 : vector<8x128xf32>
    %c0_49 = arith.constant 0 : index
    %c0_50 = arith.constant 0 : index
    %77 = vector.load %arg12[%c0_49, %c0_50] : memref<8x128xf32, #tpu.memory_space<vmem>>, vector<8x128xf32>
    tpu.vector_store %arg12[%c0_49, %c0_50], %76 {strides = array<i32>} : memref<8x128xf32, #tpu.memory_space<vmem>>, vector<8x128xf32>,
    return
  }
  func.func @transform_0(%arg0: i32) -> (i32, i32) {
    %c0_i32 = arith.constant 0 : i32
    %c0_i32_0 = arith.constant 0 : i32
    return %arg0, %c0_i32 : i32, i32
  }
  func.func @transform_1(%arg0: i32) -> (i32, i32) {
    %c0_i32 = arith.constant 0 : i32
    %c0_i32_0 = arith.constant 0 : i32
    %c0_i32_1 = arith.constant 0 : i32
    return %c0_i32, %c0_i32_0 : i32, i32
  }
  func.func @transform_2(%arg0: i32) -> (i32, i32) {
    %c0_i32 = arith.constant 0 : i32
    %c0_i32_0 = arith.constant 0 : i32
    %c0_i32_1 = arith.constant 0 : i32
    return %c0_i32, %c0_i32_0 : i32, i32
  }
  func.func @transform_3(%arg0: i32) -> (i32, i32, i32) {
    %c0_i32 = arith.constant 0 : i32
    %c0_i32_0 = arith.constant 0 : i32
    %c0_i32_1 = arith.constant 0 : i32
    %c0_i32_2 = arith.constant 0 : i32
    return %c0_i32, %c0_i32_0, %c0_i32_1 : i32, i32, i32
  }
  func.func @transform_4(%arg0: i32) -> (i32, i32, i32) {
    %c0_i32 = arith.constant 0 : i32
    %c0_i32_0 = arith.constant 0 : i32
    %c0_i32_1 = arith.constant 0 : i32
    %c0_i32_2 = arith.constant 0 : i32
    return %c0_i32, %c0_i32_0, %c0_i32_1 : i32, i32, i32
  }
  func.func @transform_5(%arg0: i32) -> (i32, i32, i32) {
    %c0_i32 = arith.constant 0 : i32
    %c0_i32_0 = arith.constant 0 : i32
    %c0_i32_1 = arith.constant 0 : i32
    %c0_i32_2 = arith.constant 0 : i32
    return %c0_i32, %c0_i32_0, %c0_i32_1 : i32, i32, i32
  }
  func.func @transform_6(%arg0: i32) -> (i32, i32, i32) {
    %c0_i32 = arith.constant 0 : i32
    %c0_i32_0 = arith.constant 0 : i32
    %c0_i32_1 = arith.constant 0 : i32
    %c0_i32_2 = arith.constant 0 : i32
    return %c0_i32, %c0_i32_0, %c0_i32_1 : i32, i32, i32
  }
  func.func @transform_7(%arg0: i32) -> (i32, i32) {
    %c0_i32 = arith.constant 0 : i32
    %c0_i32_0 = arith.constant 0 : i32
    %c0_i32_1 = arith.constant 0 : i32
    return %c0_i32, %c0_i32_0 : i32, i32
  }
  func.func @transform_8(%arg0: i32) -> (i32, i32) {
    %c0_i32 = arith.constant 0 : i32
    %c0_i32_0 = arith.constant 0 : i32
    %c0_i32_1 = arith.constant 0 : i32
    return %c0_i32, %c0_i32_0 : i32, i32
  }
  func.func @transform_9(%arg0: i32) -> (i32, i32) {
    %c0_i32 = arith.constant 0 : i32
    %c0_i32_0 = arith.constant 0 : i32
    %c0_i32_1 = arith.constant 0 : i32
    return %c0_i32, %c0_i32_0 : i32, i32
  }
  func.func @transform_10(%arg0: i32) -> (i32, i32) {
    %c0_i32 = arith.constant 0 : i32
    %c0_i32_0 = arith.constant 0 : i32
    %c0_i32_1 = arith.constant 0 : i32
    return %c0_i32, %c0_i32_0 : i32, i32
  }
  func.func @transform_11(%arg0: i32) -> (i32, i32) {
    %c0_i32 = arith.constant 0 : i32
    %c0_i32_0 = arith.constant 0 : i32
    return %arg0, %c0_i32 : i32, i32
  }
}

</mosaic_0001>

<bundles_post_ra>
// kernel: tpu_custom_call.1
= control target key start
LH: loop header
LB: loop body
LE: loop exit
PB: predicated region body
PF: predicated region fallthrough
CT: control target
= control target key end

     0   :  { %16 = vsyncpa [#allocation3], 0  ;;  %s1248_s0 = inlined_call_operand.hbm [shape: bf16[8,128], index: 0, kind: input, shape index: {}]   ;;  %s1249_s1 = inlined_call_operand.hbm [shape: bf16[128,128], index: 1, kind: input, shape index: {}]   ;;  %s1250_s2 = inlined_call_operand.hbm [shape: f32[1,128], index: 2, kind: input, shape index: {}]   ;;  %s1251_s3 = inlined_call_operand.hbm [shape: bf16[2,128,128], index: 3, kind: input, shape index: {}]   ;;  %s1252_s4 = inlined_call_operand.vmem [shape: f32[2,1,128], index: 4, kind: input, shape index: {}]   ;;  %s1253_s5 = inlined_call_operand.hbm [shape: bf16[2,128,128], index: 5, kind: input, shape index: {}]   ;;  %s1254_s6 = inlined_call_operand.vmem [shape: f32[2,1,128], index: 6, kind: input, shape index: {}]   ;;  %s1255_s7 = inlined_call_operand.vmem [shape: f32[1,128], index: 7, kind: input, shape index: {}]   ;;  %s1256_s8 = inlined_call_operand.vmem [shape: f32[1,128], index: 8, kind: input, shape index: {}]   ;;  %s1257_s9 = inlined_call_operand.hbm [shape: bf16[128,128], index: 9, kind: input, shape index: {}]   ;;  %s1258_s10 = inlined_call_operand.vmem [shape: f32[1,128], index: 10, kind: input, shape index: {}]   ;;  %s1259_s11 = inlined_call_operand.hbm [shape: f32[8,128], index: 11, kind: output, shape index: {}]  }
   0x1   :  { %17 = vsyncpa [#allocation6], 0 }
   0x2   :  { %18 = vsyncpa [#allocation9], 0 }
   0x3   :  { %19 = vsyncpa [#allocation12], 0  ;;  %s36_s19 = sshll.u32 %s1249_s1, 4  ;;  %s37_s19 = int_to_ptr.hbm [resolvable:$true] %s36_s19 }
   0x4   :  { %20 = vsyncpa [#allocation4], 0  ;;  %s1125_s20 = smov [#allocation5]   ;;  %s60_s24 = sshll.u32 %s1251_s3, 4  ;;  %s61_s24 = int_to_ptr.hbm [resolvable:$true] %s60_s24 }
   0x5   :  { %s38_s21 = sshll.u32 %s1125_s20, 4  ;;  %s1126_s25 = smov 64   ;;  %s39_s21 = int_to_ptr.vmem [resolvable:$true] %s38_s21 }
   0x6   :  { %s1127_s26 = smov 4   ;;  %s1128_s27 = smov [#allocation8]  }
   0x7   :  { %44 = dma.hbm_to_vmem [thread:$0]  %s37_s19, 1024, %s39_s21, [#allocation6], %s1126_s25, %s1126_s25, %s1127_s26  }
   0x8   :  { %s62_s28 = sshll.u32 %s1128_s27, 4  ;;  %s26_s30 = sshll.u32 %s1248_s0, 4  ;;  %s63_s28 = int_to_ptr.vmem [resolvable:$true] %s62_s28  ;;  %s27_s30 = int_to_ptr.hbm [resolvable:$true] %s26_s30 }
   0x9   :  { %68 = dma.hbm_to_vmem [thread:$0]  %s61_s24, 2048, %s63_s28, [#allocation9], %s1126_s25, %s1126_s25, %s1127_s26  }
   0xa   :  { %s50_s13 = sshll.u32 %s1250_s2, 4  ;;  %s1129_s14 = smov [#allocation2]   ;;  %s51_s13 = int_to_ptr.hbm [resolvable:$true] %s50_s13 }
   0xb   :  { %s28_s15 = sshll.u32 %s1129_s14, 4  ;;  %s1130_s16 = smov [#allocation7]   ;;  %s29_s15 = int_to_ptr.vmem [resolvable:$true] %s28_s15 }
   0xc   :  { %31 = dma.hbm_to_vmem [thread:$0]  %s27_s30, 64, %s29_s15, [#allocation3]  }
   0xd   :  { %s52_s17 = sshll.u32 %s1130_s16, 4  ;;  %s75_s0 = sshll.u32 %s1253_s5, 4  ;;  %s53_s17 = int_to_ptr.vmem [resolvable:$true] %s52_s17  ;;  %s76_s0 = int_to_ptr.hbm [resolvable:$true] %s75_s0 }
   0xe   :  { %55 = dma.hbm_to_vmem [thread:$0]  %s51_s13, 16, %s53_s17, [#allocation6]  }
   0xf   :  { %s94_s22 = sshll.u32 %s1257_s9, 4  ;;  %s1131_s23 = smov [#allocation10]   ;;  %s95_s22 = int_to_ptr.hbm [resolvable:$true] %s94_s22 }
  0x10   :  { %s77_s2 = sshll.u32 %s1131_s23, 4  ;;  %s1132_s24 = smov [#allocation11]   ;;  %s78_s2 = int_to_ptr.vmem [resolvable:$true] %s77_s2 }
  0x11   :  { %83 = dma.hbm_to_vmem [thread:$0]  %s76_s0, 2048, %s78_s2, [#allocation9], %s1126_s25, %s1126_s25, %s1127_s26  }
  0x12   :  { %s96_s27 = sshll.u32 %s1132_s24, 4  ;;  %s97_s27 = int_to_ptr.vmem [resolvable:$true] %s96_s27 }
  0x13   :  { %102 = dma.hbm_to_vmem [thread:$0]  %s95_s22, 1024, %s97_s27, [#allocation12], %s1126_s25, %s1126_s25, %s1127_s26  }
  0x14   :  { %1115 = dma.done.wait [#allocation3], 64  }
  0x15   :  { %1116 = vsyncadd [#allocation3], 4294967232 }
  0x16   :  { %1117 = dma.done.wait [#allocation6], 1040  }
  0x17   :  { %1118 = vsyncadd [#allocation6], 4294966256 }
  0x18   :  { %1119 = dma.done.wait [#allocation9], 4096  }
  0x19   :  { %1120 = vsyncadd [#allocation9], 4294963200 }
  0x1a   :  { %1121 = dma.done.wait [#allocation12], 1024  }
  0x1b   :  { %1122 = vsyncadd [#allocation12], 4294966272  ;;  %v887_v0 = vld [vmem:[#allocation5 + $0x38] sm:$0xff]  ;;  %v886_v1 = vld [vmem:[#allocation5 + $0x30] sm:$0xff]  ;;  %s1133_s15 = smov [#allocation13]  }
  0x1c   :  { %198 = vmatpush.bf16.msra.mxu0 %v887_v0  ;;  %v895_v2 = vld [vmem:[#allocation8 + $0x38] sm:$0xff]  ;;  %v885_v3 = vld [vmem:[#allocation5 + $0x28] sm:$0xff]  ;;  %v894_v4 = vld [vmem:[#allocation8 + $0x30] sm:$0xff]  ;;  %s671_s16 = sshll.u32 %s1133_s15, 4  ;;  %s672_s16 = int_to_ptr.vmem [resolvable:$true] %s671_s16 }
  0x1d   :  { %280 = vmatpush.bf16.msra.mxu1 %v895_v2  ;;  %v893_v5 = vld [vmem:[#allocation8 + $0x28] sm:$0xff]  ;;  %v884_v6 = vld [vmem:[#allocation5 + $0x20] sm:$0xff]  ;;  %v883_v8 = vld [vmem:[#allocation5 + $0x18] sm:$0xff] }
  0x1e   :  { %v892_v7 = vld [vmem:[#allocation8 + $0x20] sm:$0xff]  ;;  %v891_v9 = vld [vmem:[#allocation8 + $0x18] sm:$0xff]  ;;  %v882_v10 = vld [vmem:[#allocation5 + $0x10] sm:$0xff] }
  0x1f   :  { %v890_v11 = vld [vmem:[#allocation8 + $0x10] sm:$0xff]  ;;  %v881_v12 = vld [vmem:[#allocation5 + $0x8] sm:$0xff]  ;;  %v880_v14 = vld [vmem:[#allocation5] sm:$0xff] }
  0x20   :  { %199 = vmatpush.bf16.msra.mxu0 %v886_v1  ;;  %v889_v13 = vld [vmem:[#allocation8 + $0x8] sm:$0xff]  ;;  %v129_v15 = vld [vmem:[#allocation2] sm:$0xf]  ;;  %v888_v16 = vld [vmem:[#allocation8] sm:$0xff] }
  0x21   :  { %281 = vmatpush.bf16.msra.mxu1 %v894_v4  ;;  %v903_v17 = vld [vmem:[#allocation10 + $0x38] sm:$0xff]  ;;  %v902_v18 = vld [vmem:[#allocation10 + $0x30] sm:$0xff]  ;;  %v901_v19 = vld [vmem:[#allocation10 + $0x28] sm:$0xff] }
  0x22   :  { %359 = vmatpush.bf16.msra.mxu2 %v903_v17  ;;  %v900_v20 = vld [vmem:[#allocation10 + $0x20] sm:$0xff]  ;;  %v899_v21 = vld [vmem:[#allocation10 + $0x18] sm:$0xff]  ;;  %v898_v22 = vld [vmem:[#allocation10 + $0x10] sm:$0xff] }
  0x23   :  { %v937_v23 = vld [vmem:[#allocation7] ss:$0 sm:$0xff]  ;;  %v897_v28 = vld [vmem:[#allocation10 + $0x8] sm:$0xff]  ;;  %v896_v29 = vld [vmem:[#allocation10] sm:$0xff] }
  0x24   :  { %200 = vmatpush.bf16.msra.mxu0 %v885_v3  ;;  %v911_v30 = vld [vmem:[#allocation8 + $0x78] sm:$0xff]  ;;  %v910_v31 = vld [vmem:[#allocation8 + $0x70] sm:$0xff]  ;;  %v909_v32 = vld [vmem:[#allocation8 + $0x68] sm:$0xff] }
  0x25   :  { %282 = vmatpush.bf16.msra.mxu1 %v893_v5  ;;  %449 = vmatpush.bf16.msra.mxu3 %v911_v30  ;;  %v908_v33 = vld [vmem:[#allocation8 + $0x60] sm:$0xff]  ;;  %v907_v34 = vld [vmem:[#allocation8 + $0x58] sm:$0xff]  ;;  %v906_v35 = vld [vmem:[#allocation8 + $0x50] sm:$0xff] }
  0x26   :  { %360 = vmatpush.bf16.msra.mxu2 %v902_v18  ;;  %v938_v36 = vld [vmem:[%s1252_s4] ss:$0 sm:$0xff]  ;;  %v905_v42 = vld [vmem:[#allocation8 + $0x48] sm:$0xff]  ;;  %v904_v43 = vld [vmem:[#allocation8 + $0x40] sm:$0xff] }
  0x27   :  { %v919_v44 = vld [vmem:[#allocation10 + $0x78] sm:$0xff]  ;;  %v918_v45 = vld [vmem:[#allocation10 + $0x70] sm:$0xff]  ;;  %v917_v46 = vld [vmem:[#allocation10 + $0x68] sm:$0xff] }
  0x28   :  { %201 = vmatpush.bf16.msra.mxu0 %v884_v6  ;;  %v916_v47 = vld [vmem:[#allocation10 + $0x60] sm:$0xff]  ;;  %v915_v48 = vld [vmem:[#allocation10 + $0x58] sm:$0xff]  ;;  %v914_v49 = vld [vmem:[#allocation10 + $0x50] sm:$0xff]  ;;  %v552_v6 = vlaneseq }
  0x29   :  { %283 = vmatpush.bf16.msra.mxu1 %v892_v7  ;;  %450 = vmatpush.bf16.msra.mxu3 %v910_v31  ;;  %v939_v50 = vld [vmem:[%s1254_s6] ss:$0 sm:$0xff]  ;;  %v913_v56 = vld [vmem:[#allocation10 + $0x48] sm:$0xff]  ;;  %v912_v57 = vld [vmem:[#allocation10 + $0x40] sm:$0xff] }
  0x2a   :  { %361 = vmatpush.bf16.msra.mxu2 %v901_v19  ;;  %v940_v58 = vld [vmem:[%s1252_s4 + $0x1] ss:$0 sm:$0xff]  ;;  %v553_v7 = vand.u32 127, %v552_v6  ;;  %v922_v17 = vld [vmem:[#allocation11 + $0x10] sm:$0xff]  ;;  %v921_v18 = vld [vmem:[#allocation11 + $0x8] sm:$0xff] }
  0x2b   :  { %v941_v0 = vld [vmem:[%s1254_s6 + $0x1] ss:$0 sm:$0xff]  ;;  %v920_v19 = vld [vmem:[#allocation11] sm:$0xff] }
  0x2c   :  { %202 = vmatpush.bf16.msra.mxu0 %v883_v8  ;;  %v927_v5 = vld [vmem:[#allocation11 + $0x38] sm:$0xff]  ;;  %vm554_vm0 = vcmp.lt.s32.totalorder %v553_v7, 32 }
  0x2d   :  { %284 = vmatpush.bf16.msra.mxu1 %v891_v9  ;;  %451 = vmatpush.bf16.msra.mxu3 %v909_v32  ;;  %v943_v32 = vld [vmem:[%s1256_s8] ss:$0 sm:$0xff] }
  0x2e   :  { %362 = vmatpush.bf16.msra.mxu2 %v900_v20 }
  0x30   :  { %203 = vmatpush.bf16.msra.mxu0 %v882_v10 }
  0x31   :  { %285 = vmatpush.bf16.msra.mxu1 %v890_v11  ;;  %452 = vmatpush.bf16.msra.mxu3 %v908_v33 }
  0x32   :  { %363 = vmatpush.bf16.msra.mxu2 %v899_v21 }
  0x34   :  { %204 = vmatpush.bf16.msra.mxu0 %v881_v12 }
  0x35   :  { %286 = vmatpush.bf16.msra.mxu1 %v889_v13  ;;  %453 = vmatpush.bf16.msra.mxu3 %v907_v34  ;;  %v926_v13 = vld [vmem:[#allocation11 + $0x30] sm:$0xff] }
  0x36   :  { %364 = vmatpush.bf16.msra.mxu2 %v898_v22 }
  0x38   :  { %205 = vmatpush.bf16.msra.mxu0 %v880_v14  ;;  %v925_v14 = vld [vmem:[#allocation11 + $0x28] sm:$0xff] }
  0x39   :  { %287 = vmatpush.bf16.msra.mxu1 %v888_v16  ;;  %454 = vmatpush.bf16.msra.mxu3 %v906_v35  ;;  %v923_v16 = vld [vmem:[#allocation11 + $0x18] sm:$0xff] }
  0x3a   :  { %365 = vmatpush.bf16.msra.mxu2 %v897_v28 }
  0x3b   :  { %206 = vmatmul.bf16.vlgmr.msra.gmra.mxu0 %v129_v15  ;;  %v924_v15 = vld [vmem:[#allocation11 + $0x20] sm:$0xff] }
  0x3c   :  { %529 = vmatpush.bf16.msrb.mxu0 %v919_v44 }
  0x3d   :  { %455 = vmatpush.bf16.msra.mxu3 %v905_v42  ;;  %652 = vmatpush.bf16.msrb.mxu1 %v927_v5 }
  0x3e   :  { %366 = vmatpush.bf16.msra.mxu2 %v896_v29  ;;  %v942_v29 = vld [vmem:[%s1255_s7] ss:$0 sm:$0xff]  ;;  %s673_s7 = sshll.u32 %s1259_s11, 4  ;;  %s674_s7 = int_to_ptr.hbm [resolvable:$true] %s673_s7 }
  0x40   :  { %530 = vmatpush.bf16.msrb.mxu0 %v918_v45 }
  0x41   :  { %456 = vmatpush.bf16.msra.mxu3 %v904_v43  ;;  %653 = vmatpush.bf16.msrb.mxu1 %v926_v13 }
  0x44   :  { %531 = vmatpush.bf16.msrb.mxu0 %v917_v46 }
  0x45   :  { %654 = vmatpush.bf16.msrb.mxu1 %v925_v14 }
  0x48   :  { %532 = vmatpush.bf16.msrb.mxu0 %v916_v47 }
  0x49   :  { %655 = vmatpush.bf16.msrb.mxu1 %v924_v15 }
  0x4c   :  { %533 = vmatpush.bf16.msrb.mxu0 %v915_v48 }
  0x4d   :  { %656 = vmatpush.bf16.msrb.mxu1 %v923_v16 }
  0x50   :  { %534 = vmatpush.bf16.msrb.mxu0 %v914_v49 }
  0x51   :  { %657 = vmatpush.bf16.msrb.mxu1 %v922_v17 }
  0x54   :  { %535 = vmatpush.bf16.msrb.mxu0 %v913_v56 }
  0x55   :  { %658 = vmatpush.bf16.msrb.mxu1 %v921_v18 }
  0x58   :  { %536 = vmatpush.bf16.msrb.mxu0 %v912_v57 }
  0x59   :  { %659 = vmatpush.bf16.msrb.mxu1 %v920_v19 }
  0xb8   :  { %v207_v24 = vpop.f32.mrf.mxu0 }
  0xb9   :  { %v208_v25 = vadd.f32 %v937_v23, %v207_v24 }
  0xbb   :  { %v211_v26 = vpack.c.bf16 %v208_v25, %v208_v25 }
  0xbd   :  { %288 = vmatmul.bf16.vlgmr.msra.gmra.mxu1 %v211_v26 }
  0xc0   :  { %v209_v27 = vpop.f32.mrf.mxu0 }
 0x13a   :  { %v289_v37 = vpop.f32.mrf.mxu1 }
 0x13b   :  { %v290_v38 = vadd.f32 %v938_v36, %v289_v37  ;;  %v944_v36 = vld [vmem:[%s1258_s10] ss:$0 sm:$0xff] }
 0x13d   :  { %v293_v39 = vmax.f32 %v290_v38, 0.0 }
 0x13f   :  { %v294_v40 = vpack.c.bf16 %v293_v39, %v293_v39 }
 0x141   :  { %367 = vmatmul.bf16.vlgmr.msra.gmra.mxu2 %v294_v40 }
 0x142   :  { %v291_v41 = vpop.f32.mrf.mxu1 }
 0x1c4   :  { %v368_v51 = vpop.f32.mrf.mxu2 }
 0x1c5   :  { %v372_v52 = vadd.f32 %v368_v51, %v208_v25 }
 0x1c7   :  { %v377_v53 = vadd.f32 %v939_v50, %v372_v52 }
 0x1c9   :  { %v378_v54 = vpack.c.bf16 %v377_v53, %v377_v53 }
 0x1cb   :  { %457 = vmatmul.bf16.vlgmr.msra.gmra.mxu3 %v378_v54 }
 0x1cc   :  { %v370_v55 = vpop.f32.mrf.mxu2 }
 0x24e   :  { %v458_v59 = vpop.f32.mrf.mxu3 }
 0x24f   :  { %v459_v60 = vadd.f32 %v940_v58, %v458_v59 }
 0x251   :  { %v462_v61 = vmax.f32 %v459_v60, 0.0 }
 0x253   :  { %v463_v62 = vpack.c.bf16 %v462_v61, %v462_v61 }
 0x255   :  { %537 = vmatmul.bf16.vlgmr.msrb.gmra.mxu0 %v463_v62 }
 0x256   :  { %v460_v63 = vpop.f32.mrf.mxu3 }
 0x2d2   :  { %v538_v1 = vpop.f32.mrf.mxu0 }
 0x2d3   :  { %v542_v2 = vadd.f32 %v538_v1, %v377_v53 }
 0x2d5   :  { %v548_v3 = vadd.f32 %v941_v0, %v542_v2 }
 0x2d7   :  { %549 = vadd.xlane.f32.xlu0 %v548_v3 }
 0x2da   :  { %v540_v4 = vpop.f32.mrf.mxu0 }
 0x34a   :  { %v550_v8 = vpop.xlane.xlu0 %549 }
 0x34b   :  { %v551_v9 = vmul.f32 0.03125, %v550_v8 }
 0x34d   :  { %v555_v10 = vsub.f32 %v548_v3, %v551_v9 }
 0x34f   :  { %v556_v11 = vsel %vm554_vm0, %v555_v10, 0.0 }
 0x350   :  { %v557_v12 = vmul.f32 %v556_v11, %v556_v11 }
 0x352   :  { %558 = vadd.xlane.f32.xlu0 %v557_v12 }
 0x3c5   :  { %v559_v20 = vpop.xlane.xlu0 %558 }
 0x3c6   :  { %v560_v21 = vmul.f32 0.03125, %v559_v20 }
 0x3c8   :  { %v561_v22 = vadd.f32 1e-05, %v560_v21 }
 0x3ca   :  { %945 = vrsqrt.f32 %v561_v22  ;;  %vm568_vm2 = vweird.f32 %v561_v22 }
 0x3d0   :  { %v946_v23 = vpop.eup %945 }
 0x3d1   :  { %v563_v24 = vmul.f32 %v946_v23, %v561_v22  ;;  %vm569_vm1 = vweird.f32 %v946_v23 }
 0x3d2   :  { %vm570_vm3 = vmor %vm568_vm2, %vm569_vm1 }
 0x3d3   :  { %v564_v25 = vmul.f32 %v946_v23, %v563_v24 }
 0x3d5   :  { %v565_v26 = vmul.f32 0.5, %v564_v25 }
 0x3d7   :  { %v566_v27 = vsub.f32 1.5, %v565_v26 }
 0x3d9   :  { %v567_v28 = vmul.f32 %v946_v23, %v566_v27 }
 0x3db   :  { %v571_v30 = vsel %vm570_vm3, %v946_v23, %v567_v28 }
 0x3dc   :  { %v572_v31 = vmul.f32 %v571_v30, %v556_v11 }
 0x3de   :  { %v577_v33 = vmul.f32 %v942_v29, %v572_v31 }
 0x3e0   :  { %v582_v34 = vadd.f32 %v943_v32, %v577_v33 }
 0x3e2   :  { %v583_v35 = vpack.c.bf16 %v582_v34, %v582_v34 }
 0x3e4   :  { %660 = vmatmul.bf16.vlgmr.msrb.gmra.mxu1 %v583_v35 }
 0x461   :  { %v661_v37 = vpop.f32.mrf.mxu1 }
 0x462   :  { %v662_v38 = vadd.f32 %v944_v36, %v661_v37 }
 0x464   :  { %665 = vst [vmem:[#allocation13] sm:$0xff] %v662_v38 }
 0x465   :  { %676 = dma.vmem_to_hbm [thread:$0]  %s672_s16, 128, %s674_s7, [#allocation4]  }
 0x469   :  { %v663_v39 = vpop.f32.mrf.mxu1 }
 0x46a   :  { %1123 = dma.done.wait [#allocation4], 128  }
 0x46b   :  { %1124 = vsyncadd [#allocation4], 4294967168 }
 0x46c   :  { %681 = vsyncpa [#allocation3], 1 }
 0x46d   :  { %682 = vsyncpa [#allocation6], 1 }
 0x46e   :  { %683 = vsyncpa [#allocation9], 1 }
 0x46f   :  { %684 = vsyncpa [#allocation12], 1 }
 0x470   :  { %685 = vsyncpa [#allocation4], 1 }

</bundles_post_ra>
